<compile_context>
chip_gen: v6e
topology: v6e:2x2x1
jax: 0.10.0
libtpu: 0.0.40
codegen_flags: <defaults>
</compile_context>

<pallas_src>
import jax
import jax.numpy as jnp
from jax.experimental import pallas as pl
from jax.experimental.pallas import tpu as pltpu

_LANE = 128      # vreg lane width  (last dim)
_SUBLANE = 8     # f32 sublane count (second-last dim)
_MXU_M = 256     # MXU M-pass width (v6e/v7x)


def _round_up(n, m):
    return ((n + m - 1) // m) * m


# ----------------------------------------------------------------------------------------
# Resident-parameter BlockSpecs: constant index_map (fetched once, stays in VMEM) and a
# single pipeline buffer.  Fall back to the default (double-buffered) spec if this JAX
# version does not accept pipeline_mode=.
try:
    pl.BlockSpec((_SUBLANE, _LANE), lambda i: (0, 0), pipeline_mode=pl.Buffered(1))
    _HAS_BUFFERED = True
except Exception:  # pragma: no cover - older JAX
    _HAS_BUFFERED = False
_PARAM_BUF_FACTOR = 1 if _HAS_BUFFERED else 2


def _param_block_spec(shape):
    if _HAS_BUFFERED:
        return pl.BlockSpec(shape, lambda i: (0, 0), pipeline_mode=pl.Buffered(1))
    return pl.BlockSpec(shape, lambda i: (0, 0))


def _activation(nonlinearity):
    if nonlinearity == "Identity":
        return lambda h: h
    if nonlinearity == "ReLU":
        return lambda h: jnp.maximum(h, 0.0)
    if nonlinearity == "Tanh":
        return jnp.tanh
    # TODO(synk): other torch.nn activations (GELU, Sigmoid, ...) could be added here.
    raise ValueError(f"unsupported nonlinearity: {nonlinearity}")


def _make_mlp_kernel(num_layers, nonlinearity, compute_dtype):
    """Fused MLP body.  Ref layout: (x, w_0, b_0, ..., w_{L-1}, b_{L-1}, out)."""
    act = _activation(nonlinearity)

    def kernel(*refs):
        x_ref = refs[0]
        o_ref = refs[-1]
        params = refs[1:-1]
        # Cast to the MXU operand dtype in-register (no wrapper-side HBM pass over x).
        h = x_ref[...].astype(compute_dtype)
        for layer in range(num_layers):
            w = params[2 * layer][...]
            b = params[2 * layer + 1][...]            # f32 bias, shape (1, N)
            h = jnp.dot(h, w.astype(compute_dtype),
                        preferred_element_type=jnp.float32) + b
            if layer < num_layers - 1:
                # normalization = nn.Identity(); dropout p=0.0 => no-ops.
                h = act(h)                            # elementwise stays in f32
                h = h.astype(compute_dtype)           # re-quantize for next MXU pass
        o_ref[...] = h.astype(o_ref.dtype)

    return kernel


def _choose_batch_tile(B, batch_tile, sublane):
    """Pick the batch tile.

    - B <= 256: one full-batch block (a block dim equal to the full array dim is legal,
      so no batch padding / rounding is needed).
    - 256 < B <= batch_tile: split into >= 2 grid steps so dimension_semantics
      ("parallel",) can shard the batch across v7x's two TensorCores.
    - large B: `batch_tile` rows, rounded to the MXU's 256-row M pass when possible.
    Ragged tails are handled by a partial last block (grid = pl.cdiv(B, bt)).
    """
    batch_tile = max(int(batch_tile), sublane)
    if B <= _MXU_M:
        return B
    if B <= batch_tile:
        return _round_up(pl.cdiv(B, 2), _MXU_M if B >= 2 * _MXU_M else sublane)
    if batch_tile >= _MXU_M:
        return _round_up(batch_tile, _MXU_M)
    return _round_up(batch_tile, sublane)


def prepare_mlp_params(weights, biases, *, mxu_dtype=None,
                       auto_bf16_weight_bytes=40 << 20):
    """One-time pad/cast of the MLP parameters (hoisted out of the forward hot path).

    weights: list of [in_dim, out_dim] arrays (transpose of torch's [out, in] layout)
    biases:  list of [out_dim] arrays
    mxu_dtype: optional MXU operand dtype (bf16 is fine on v5e, v6e and v7x — the MXU is
      bf16-native everywhere; accumulation, bias add and activations stay f32).  If None
      and the padded f32 weights exceed `auto_bf16_weight_bytes`, bf16 is chosen
      automatically so the resident weights fit v7x's 64 MiB/TC VMEM.

    Padding: every layer *output* dim is zero-padded to a multiple of 128 (lane-dense MXU
    N and unmasked output stores); the input dim of layer l>0 is padded to the previous
    layer's padded output.  Layer 0 keeps the true feature size as K so x needs no pad.
    Zero padding is mathematically inert (padded weight rows/cols and biases are 0).
    """
    assert len(weights) == len(biases) and len(weights) >= 1
    feature_size = int(weights[0].shape[0])
    out_dims = [int(w.shape[1]) for w in weights]
    out_p = [_round_up(d, _LANE) for d in out_dims]
    in_p = [feature_size] + out_p[:-1]

    padded_f32_bytes = sum(ip * op * 4 for ip, op in zip(in_p, out_p))
    if mxu_dtype is None and padded_f32_bytes > auto_bf16_weight_bytes:
        mxu_dtype = jnp.bfloat16
    # TODO(synk): if even bf16 residency exceeds the v7x 64 MiB/TC budget, fall back to a
    # per-layer K/N-tiled pltpu.emit_pipeline over the hidden dim instead of residency.

    w_pad, b_pad = [], []
    for l, (w, b) in enumerate(zip(weights, biases)):
        wp = jnp.pad(w, ((0, in_p[l] - w.shape[0]), (0, out_p[l] - w.shape[1])))
        if mxu_dtype is not None:
            wp = wp.astype(mxu_dtype)                 # halves weight DMA + VMEM bytes
        bp = jnp.pad(b.reshape(1, -1).astype(jnp.float32),
                     ((0, 0), (0, out_p[l] - b.shape[0])))
        w_pad.append(wp)
        b_pad.append(bp)

    return dict(weights=w_pad, biases=b_pad, feature_size=feature_size,
                out_dims=out_dims, out_p=out_p, in_p=in_p, mxu_dtype=mxu_dtype)


def mlp_forward(x, params, *, nonlinearity="Identity", batch_tile=512,
                vmem_limit_bytes=None):
    """Run the fused MLP Pallas kernel on pre-padded params from prepare_mlp_params."""
    B, F = x.shape
    assert F == params["feature_size"], "feature dim mismatch"
    w_pad, b_pad = params["weights"], params["biases"]
    in_p, out_p, out_dims = params["in_p"], params["out_p"], params["out_dims"]
    mxu_dtype = params["mxu_dtype"]
    num_layers = len(w_pad)
    num_targets = out_dims[-1]
    Np = out_p[-1]
    out_dtype = x.dtype
    compute_dtype = jnp.float32 if mxu_dtype is None else jnp.dtype(mxu_dtype)

    # Packed-sublane-aware batch tile; ragged batch handled by a partial last block.
    sublane = _SUBLANE * max(1, 4 // jnp.dtype(compute_dtype).itemsize)
    bt = _choose_batch_tile(B, batch_tile, sublane)
    grid = (pl.cdiv(B, bt),)

    # x block: full (unpadded) feature dim -> no wrapper-side HBM pass over x at all.
    # TODO(synk): if profiling a large-hidden config shows exposed x DMA, bump this spec
    # to pipeline_mode=pl.Buffered(3).
    in_specs = [pl.BlockSpec((bt, F), lambda i: (i, 0))]
    operands = [x]
    for wp, bp in zip(w_pad, b_pad):
        in_specs.append(_param_block_spec(wp.shape))
        in_specs.append(_param_block_spec(bp.shape))
        operands += [wp, bp]
    out_specs = pl.BlockSpec((bt, Np), lambda i: (i, 0))   # lane-dense output stores

    # ---- explicit VMEM budget ----------------------------------------------------------
    param_bytes = (sum(int(w.size) * w.dtype.itemsize for w in w_pad)
                   + sum(int(b.size) * b.dtype.itemsize for b in b_pad))
    io_bytes = (2 * bt * F * x.dtype.itemsize
                + 2 * bt * Np * jnp.dtype(out_dtype).itemsize)
    interm_bytes = 2 * bt * max(out_p) * 4                 # f32 layer intermediates
    if vmem_limit_bytes is None:
        vmem_limit_bytes = (_PARAM_BUF_FACTOR * param_bytes + io_bytes + interm_bytes
                            + (4 << 20))                   # headroom
        vmem_limit_bytes = min(max(vmem_limit_bytes, 32 << 20), 64 << 20)

    # ---- cost estimate so XLA can schedule around the custom call ----------------------
    flops = 2 * B * sum(k * n for k, n in zip(in_p, out_p))
    bytes_accessed = (int(x.size) * x.dtype.itemsize + param_bytes
                      + B * Np * jnp.dtype(out_dtype).itemsize)
    transcendentals = B * sum(out_dims[:-1]) if nonlinearity == "Tanh" else 0

    kernel = _make_mlp_kernel(num_layers, nonlinearity, compute_dtype)

    out_padded = pl.pallas_call(
        kernel,
        out_shape=jax.ShapeDtypeStruct((B, Np), out_dtype),
        grid_spec=pltpu.PrefetchScalarGridSpec(
            num_scalar_prefetch=0,
            grid=grid,
            in_specs=in_specs,
            out_specs=out_specs,
        ),
        compiler_params=pltpu.CompilerParams(
            dimension_semantics=("parallel",),
            vmem_limit_bytes=int(vmem_limit_bytes),
        ),
        cost_estimate=pl.CostEstimate(
            flops=int(flops),
            transcendentals=int(transcendentals),
            bytes_accessed=int(bytes_accessed),
        ),
    )(*operands)

    # Strip the lane padding of the output features (batch is never padded).
    return out_padded[:, :num_targets]


def init_mlp_params(key, feature_size, hidden_layer_sizes, num_targets):
    """Deterministic nn.Linear-style init (uniform(-1/sqrt(fan_in), 1/sqrt(fan_in)))."""
    dims = [feature_size] + list(hidden_layer_sizes) + [num_targets]
    weights, biases = [], []
    for d_in, d_out in zip(dims[:-1], dims[1:]):
        key, kw, kb = jax.random.split(key, 3)
        bound = 1.0 / jnp.sqrt(jnp.float32(d_in))
        w = jax.random.uniform(kw, (d_in, d_out), jnp.float32, -bound, bound)
        b = jax.random.uniform(kb, (d_out,), jnp.float32, -bound, bound)
        weights.append(w)
        biases.append(b)
    return weights, biases


def mlp_reference(x, weights, biases, nonlinearity="Identity"):
    act = _activation(nonlinearity)
    h = x
    for i, (w, b) in enumerate(zip(weights, biases)):
        h = h @ w + b
        if i < len(weights) - 1:
            h = act(h)
    return h


if __name__ == "__main__":
    # Config consistent with the module:
    #   MultilayerPerceptron(feature_size=32, hidden_layer_sizes=[64, 48],
    #                        num_targets=16, nonlinearity='ReLU')
    feature_size = 32
    hidden_layer_sizes = [64, 48]
    num_targets = 16

    key = jax.random.PRNGKey(0)
    key, kx = jax.random.split(key)
    weights, biases = init_mlp_params(key, feature_size, hidden_layer_sizes, num_targets)

    # One-time parameter preparation (padding / casting hoisted out of the hot path).
    params_f32 = prepare_mlp_params(weights, biases)

    # --- small ragged batch: single full-batch block, grid=(1,) -------------------------
    batch = 20
    x = jax.random.normal(kx, (batch, feature_size), jnp.float32)

    out = jax.block_until_ready(mlp_forward(x, params_f32, nonlinearity="ReLU"))
    ref = mlp_reference(x, weights, biases, "ReLU")
    assert out.shape == (batch, num_targets)
    assert jnp.allclose(out, ref, atol=1e-5, rtol=1e-5), "ReLU path mismatch vs reference"

    out_id = jax.block_until_ready(mlp_forward(x, params_f32, nonlinearity="Identity"))
    ref_id = mlp_reference(x, weights, biases, "Identity")
    assert jnp.allclose(out_id, ref_id, atol=1e-5, rtol=1e-5), "Identity path mismatch"

    # --- bf16 MXU operands (valid on v5e/v6e/v7x; accumulation stays f32) ---------------
    params_bf16 = prepare_mlp_params(weights, biases, mxu_dtype=jnp.bfloat16)
    out_bf = jax.block_until_ready(mlp_forward(x, params_bf16, nonlinearity="ReLU"))
    assert jnp.allclose(out_bf, ref, atol=1e-1, rtol=1e-1), "bf16 path mismatch"

    # --- larger ragged batch: multi-step grid (>=2 tiles) with a partial last block -----
    batch2 = 300
    key, kx2 = jax.random.split(key)
    x2 = jax.random.normal(kx2, (batch2, feature_size), jnp.float32)
    out2 = jax.block_until_ready(mlp_forward(x2, params_f32, nonlinearity="ReLU"))
    ref2 = mlp_reference(x2, weights, biases, "ReLU")
    assert out2.shape == (batch2, num_targets)
    assert jnp.allclose(out2, ref2, atol=1e-5, rtol=1e-5), "multi-tile ragged batch mismatch"

    print("KERNEL_OK")
</pallas_src>

<mosaic_0001>
module attributes {stable_mosaic.version = 11 : i64} {
  func.func @kernel(%arg0: i32, %arg1: memref<20x32xf32, #tpu.memory_space<vmem>>, %arg2: memref<32x128xf32, #tpu.memory_space<vmem>>, %arg3: memref<1x128xf32, #tpu.memory_space<vmem>>, %arg4: memref<128x128xf32, #tpu.memory_space<vmem>>, %arg5: memref<1x128xf32, #tpu.memory_space<vmem>>, %arg6: memref<128x128xf32, #tpu.memory_space<vmem>>, %arg7: memref<1x128xf32, #tpu.memory_space<vmem>>, %arg8: memref<20x128xf32, #tpu.memory_space<vmem>>) attributes {dimension_semantics = [#tpu.dimension_semantics<parallel>], iteration_bounds = array<i64: 1>, scalar_prefetch = 0 : i64, scratch_operands = 0 : i64, tpu.core_type = #tpu.core_type<tc>, window_params = [{transform_indices = @transform_0, window_bounds = array<i64: 20, 32>}, {pipeline_mode = #tpu.pipeline_mode<synchronous>, transform_indices = @transform_1, window_bounds = array<i64: 32, 128>}, {pipeline_mode = #tpu.pipeline_mode<synchronous>, transform_indices = @transform_2, window_bounds = array<i64: 1, 128>}, {pipeline_mode = #tpu.pipeline_mode<synchronous>, transform_indices = @transform_3, window_bounds = array<i64: 128, 128>}, {pipeline_mode = #tpu.pipeline_mode<synchronous>, transform_indices = @transform_4, window_bounds = array<i64: 1, 128>}, {pipeline_mode = #tpu.pipeline_mode<synchronous>, transform_indices = @transform_5, window_bounds = array<i64: 128, 128>}, {pipeline_mode = #tpu.pipeline_mode<synchronous>, transform_indices = @transform_6, window_bounds = array<i64: 1, 128>}, {transform_indices = @transform_7, window_bounds = array<i64: 20, 128>}]} {
    %c0 = arith.constant 0 : index
    %c0_0 = arith.constant 0 : index
    %0 = vector.load %arg1[%c0, %c0_0] : memref<20x32xf32, #tpu.memory_space<vmem>>, vector<20x32xf32>
    %c0_1 = arith.constant 0 : index
    %c0_2 = arith.constant 0 : index
    %1 = vector.load %arg2[%c0_1, %c0_2] : memref<32x128xf32, #tpu.memory_space<vmem>>, vector<32x128xf32>
    %c0_3 = arith.constant 0 : index
    %c0_4 = arith.constant 0 : index
    %2 = vector.load %arg3[%c0_3, %c0_4] : memref<1x128xf32, #tpu.memory_space<vmem>>, vector<1x128xf32>
    %cst = arith.constant dense<0.000000e+00> : vector<20x128xf32>
    %3 = tpu.matmul %0, %1, %cst {dimension_numbers = #tpu.dot_dimension_numbers<[1], [0], [0], [1], [0, 0, 1, 1], [], []>} : vector<20x32xf32>, vector<32x128xf32>, vector<20x128xf32> -> vector<20x128xf32>
    %4 = vector.broadcast %2 : vector<1x128xf32> to vector<20x128xf32>
    %5 = arith.addf %3, %4 : vector<20x128xf32>
    %cst_5 = arith.constant 0.000000e+00 : f32
    %6 = vector.broadcast %cst_5 : f32 to vector<20x128xf32>
    %7 = arith.maximumf %5, %6 : vector<20x128xf32>
    %c0_6 = arith.constant 0 : index
    %c0_7 = arith.constant 0 : index
    %8 = vector.load %arg4[%c0_6, %c0_7] : memref<128x128xf32, #tpu.memory_space<vmem>>, vector<128x128xf32>
    %c0_8 = arith.constant 0 : index
    %c0_9 = arith.constant 0 : index
    %9 = vector.load %arg5[%c0_8, %c0_9] : memref<1x128xf32, #tpu.memory_space<vmem>>, vector<1x128xf32>
    %cst_10 = arith.constant dense<0.000000e+00> : vector<20x128xf32>
    %10 = tpu.matmul %7, %8, %cst_10 {dimension_numbers = #tpu.dot_dimension_numbers<[1], [0], [0], [1], [0, 0, 1, 1], [], []>} : vector<20x128xf32>, vector<128x128xf32>, vector<20x128xf32> -> vector<20x128xf32>
    %11 = vector.broadcast %9 : vector<1x128xf32> to vector<20x128xf32>
    %12 = arith.addf %10, %11 : vector<20x128xf32>
    %cst_11 = arith.constant 0.000000e+00 : f32
    %13 = vector.broadcast %cst_11 : f32 to vector<20x128xf32>
    %14 = arith.maximumf %12, %13 : vector<20x128xf32>
    %c0_12 = arith.constant 0 : index
    %c0_13 = arith.constant 0 : index
    %15 = vector.load %arg6[%c0_12, %c0_13] : memref<128x128xf32, #tpu.memory_space<vmem>>, vector<128x128xf32>
    %c0_14 = arith.constant 0 : index
    %c0_15 = arith.constant 0 : index
    %16 = vector.load %arg7[%c0_14, %c0_15] : memref<1x128xf32, #tpu.memory_space<vmem>>, vector<1x128xf32>
    %cst_16 = arith.constant dense<0.000000e+00> : vector<20x128xf32>
    %17 = tpu.matmul %14, %15, %cst_16 {dimension_numbers = #tpu.dot_dimension_numbers<[1], [0], [0], [1], [0, 0, 1, 1], [], []>} : vector<20x128xf32>, vector<128x128xf32>, vector<20x128xf32> -> vector<20x128xf32>
    %18 = vector.broadcast %16 : vector<1x128xf32> to vector<20x128xf32>
    %19 = arith.addf %17, %18 : vector<20x128xf32>
    %c0_17 = arith.constant 0 : index
    %c0_18 = arith.constant 0 : index
    %20 = vector.load %arg8[%c0_17, %c0_18] : memref<20x128xf32, #tpu.memory_space<vmem>>, vector<20x128xf32>
    tpu.vector_store %arg8[%c0_17, %c0_18], %19 {strides = array<i32>} : memref<20x128xf32, #tpu.memory_space<vmem>>, vector<20x128xf32>,
    return
  }
  func.func @transform_0(%arg0: i32) -> (i32, i32) {
    %c0_i32 = arith.constant 0 : i32
    %c0_i32_0 = arith.constant 0 : i32
    return %arg0, %c0_i32 : i32, i32
  }
  func.func @transform_1(%arg0: i32) -> (i32, i32) {
    %c0_i32 = arith.constant 0 : i32
    %c0_i32_0 = arith.constant 0 : i32
    %c0_i32_1 = arith.constant 0 : i32
    return %c0_i32, %c0_i32_0 : i32, i32
  }
  func.func @transform_2(%arg0: i32) -> (i32, i32) {
    %c0_i32 = arith.constant 0 : i32
    %c0_i32_0 = arith.constant 0 : i32
    %c0_i32_1 = arith.constant 0 : i32
    return %c0_i32, %c0_i32_0 : i32, i32
  }
  func.func @transform_3(%arg0: i32) -> (i32, i32) {
    %c0_i32 = arith.constant 0 : i32
    %c0_i32_0 = arith.constant 0 : i32
    %c0_i32_1 = arith.constant 0 : i32
    return %c0_i32, %c0_i32_0 : i32, i32
  }
  func.func @transform_4(%arg0: i32) -> (i32, i32) {
    %c0_i32 = arith.constant 0 : i32
    %c0_i32_0 = arith.constant 0 : i32
    %c0_i32_1 = arith.constant 0 : i32
    return %c0_i32, %c0_i32_0 : i32, i32
  }
  func.func @transform_5(%arg0: i32) -> (i32, i32) {
    %c0_i32 = arith.constant 0 : i32
    %c0_i32_0 = arith.constant 0 : i32
    %c0_i32_1 = arith.constant 0 : i32
    return %c0_i32, %c0_i32_0 : i32, i32
  }
  func.func @transform_6(%arg0: i32) -> (i32, i32) {
    %c0_i32 = arith.constant 0 : i32
    %c0_i32_0 = arith.constant 0 : i32
    %c0_i32_1 = arith.constant 0 : i32
    return %c0_i32, %c0_i32_0 : i32, i32
  }
  func.func @transform_7(%arg0: i32) -> (i32, i32) {
    %c0_i32 = arith.constant 0 : i32
    %c0_i32_0 = arith.constant 0 : i32
    return %arg0, %c0_i32 : i32, i32
  }
}

</mosaic_0001>

<bundles_post_ra>
// kernel: tpu_custom_call.1
= control target key start
LH: loop header
LB: loop body
LE: loop exit
PB: predicated region body
PF: predicated region fallthrough
CT: control target
= control target key end

     0   :  { %12 = vsyncpa [#allocation3], 0  ;;  %s832_s0 = inlined_call_operand.hbm [shape: f32[20,32], index: 0, kind: input, shape index: {}]   ;;  %s833_s1 = inlined_call_operand.hbm [shape: f32[32,128], index: 1, kind: input, shape index: {}]   ;;  %s834_s2 = inlined_call_operand.vmem [shape: f32[1,128], index: 2, kind: input, shape index: {}]   ;;  %s835_s3 = inlined_call_operand.hbm [shape: f32[128,128], index: 3, kind: input, shape index: {}]   ;;  %s836_s4 = inlined_call_operand.vmem [shape: f32[1,128], index: 4, kind: input, shape index: {}]   ;;  %s837_s5 = inlined_call_operand.hbm [shape: f32[128,128], index: 5, kind: input, shape index: {}]   ;;  %s838_s6 = inlined_call_operand.vmem [shape: f32[1,128], index: 6, kind: input, shape index: {}]   ;;  %s839_s7 = inlined_call_operand.hbm [shape: f32[20,128], index: 7, kind: output, shape index: {}]  }
   0x1   :  { %13 = vsyncpa [#allocation6], 0 }
   0x2   :  { %14 = vsyncpa [#allocation9], 0 }
   0x3   :  { %15 = vsyncpa [#allocation4], 0  ;;  %s687_s24 = smov [#allocation5]   ;;  %s688_s26 = smov [#allocation2]  }
   0x4   :  { %s33_s25 = sshll.u32 %s687_s24, 4  ;;  %s21_s27 = sshll.u32 %s688_s26, 4  ;;  %s34_s25 = int_to_ptr.vmem [resolvable:$true] %s33_s25  ;;  %s22_s27 = int_to_ptr.vmem [resolvable:$true] %s21_s27 }
   0x5   :  { %s587_s28 = scalar_lea.vmem %s34_s25, 512  ;;  %p592_p1 = scmp.lt.s32.totalorder %s34_s25, %s34_s25 }
   0x6   :  { %p588_p0 = scmp.ne.s32.totalorder %s34_s25, %s587_s28  ;;  %p593_p2 = scmp.lt.s32.totalorder %s587_s28, %s587_s28 }
   0x8   :  { %p594_p3 = por %p593_p2, %p592_p1 }
   0xa   :  { %p595_p4 = pnand %p594_p3, %p588_p0 }
   0xc   :  { %598 = shalt.err (!%p595_p4)
}
   0xd   :  { %s689_s29 = smov 128   ;;  %s690_s30 = smov 8  }
   0xe   :  { %39 = dma.hbm_to_vmem [thread:$0]  %s833_s1, 512, %s34_s25, [#allocation6], %s689_s29, %s689_s29, %s690_s30  }
   0xf   :  { %s607_s10 = scalar_lea.vmem %s22_s27, 384  ;;  %p612_p6 = scmp.lt.s32.totalorder %s22_s27, %s22_s27 }
  0x10   :  { %p608_p5 = scmp.ne.s32.totalorder %s22_s27, %s607_s10  ;;  %p613_p7 = scmp.lt.s32.totalorder %s607_s10, %s607_s10 }
  0x12   :  { %p614_p8 = por %p613_p7, %p612_p6 }
  0x14   :  { %p615_p9 = pnand %p614_p8, %p608_p5 }
  0x16   :  { %618 = shalt.err (!%p615_p9)
}
  0x17   :  { %27 = dma.hbm_to_vmem [thread:$0]  %s832_s0, 384, %s22_s27, [#allocation3], %s689_s29, %s689_s29, %s690_s30  }
  0x18   :  { %s691_s13 = smov [#allocation7]   ;;  %s692_s15 = smov [#allocation8]  }
  0x19   :  { %s47_s14 = sshll.u32 %s691_s13, 4  ;;  %s61_s16 = sshll.u32 %s692_s15, 4  ;;  %s48_s14 = int_to_ptr.vmem [resolvable:$true] %s47_s14  ;;  %s62_s16 = int_to_ptr.vmem [resolvable:$true] %s61_s16 }
  0x1a   :  { %s627_s1 = scalar_lea.vmem %s48_s14, 2048  ;;  %p632_p11 = scmp.lt.s32.totalorder %s48_s14, %s48_s14 }
  0x1b   :  { %p628_p10 = scmp.ne.s32.totalorder %s48_s14, %s627_s1  ;;  %p633_p12 = scmp.lt.s32.totalorder %s627_s1, %s627_s1 }
  0x1d   :  { %p634_p13 = por %p633_p12, %p632_p11 }
  0x1f   :  { %p635_p0 = pnand %p634_p13, %p628_p10 }
  0x21   :  { %638 = shalt.err (!%p635_p0)
}
  0x22   :  { %53 = dma.hbm_to_vmem [thread:$0]  %s835_s3, 2048, %s48_s14, [#allocation6], %s689_s29, %s689_s29, %s690_s30  }
  0x23   :  { %s647_s0 = scalar_lea.vmem %s62_s16, 2048  ;;  %p652_p2 = scmp.lt.s32.totalorder %s62_s16, %s62_s16 }
  0x24   :  { %p648_p1 = scmp.ne.s32.totalorder %s62_s16, %s647_s0  ;;  %p653_p3 = scmp.lt.s32.totalorder %s647_s0, %s647_s0 }
  0x26   :  { %p654_p4 = por %p653_p3, %p652_p2 }
  0x28   :  { %p655_p5 = pnand %p654_p4, %p648_p1 }
  0x2a   :  { %658 = shalt.err (!%p655_p5)
}
  0x2b   :  { %67 = dma.hbm_to_vmem [thread:$0]  %s837_s5, 2048, %s62_s16, [#allocation9], %s689_s29, %s689_s29, %s690_s30  }
  0x2c   :  { %679 = dma.done.wait [#allocation3], 384  }
  0x2d   :  { %680 = vsyncadd [#allocation3], 4294966912 }
  0x2e   :  { %681 = dma.done.wait [#allocation6], 2560  }
  0x2f   :  { %682 = vsyncadd [#allocation6], 4294964736 }
  0x30   :  { %683 = dma.done.wait [#allocation9], 2048  }
  0x31   :  { %684 = vsyncadd [#allocation9], 4294965248  ;;  %v693_v0 = vmov 0.0   ;;  %vm694_vm0 = vmmov 0   ;;  %v88_v1 = vld [vmem:[#allocation5 + $0x18] sm:$0xff]  ;;  %v87_v2 = vld [vmem:[#allocation5 + $0x10] sm:$0xff] }
  0x32   :  { %471 = vmatprep.subr.mxu0 %v693_v0  ;;  %479 = vmatprep.mubr.msk.f32.mxu0 %vm694_vm0, %v693_v0  ;;  %v86_v3 = vld [vmem:[#allocation5 + $0x8] sm:$0xff]  ;;  %v204_v4 = vld [vmem:[#allocation7 + $0x78] sm:$0xff]  ;;  %v203_v5 = vld [vmem:[#allocation7 + $0x70] sm:$0xff]  ;;  %vm96_vm1 = vcmask 261120   ;;  %s695_s23 = smov [#allocation10]  }
  0x33   :  { %488 = vmatprep.subr.mxu1 %v693_v0  ;;  %520 = vmatprep.mubr.msk.f32.mxu1 %vm694_vm0, %v693_v0  ;;  %v85_v6 = vld [vmem:[#allocation5] sm:$0xff]  ;;  %v202_v7 = vld [vmem:[#allocation7 + $0x68] sm:$0xff]  ;;  %v200_v10 = vld [vmem:[#allocation7 + $0x58] sm:$0xff]  ;;  %s406_s24 = sshll.u32 %s695_s23, 4  ;;  %s407_s24 = int_to_ptr.vmem [resolvable:$true] %s406_s24 }
  0x34   :  { %472 = vmatpush3.msra.mxu0 %v88_v1  ;;  %489 = vmatpush3.msra.mxu1 %v204_v4  ;;  %v82_v8 = vld [vmem:[#allocation2] sm:$0xff]  ;;  %v201_v9 = vld [vmem:[#allocation7 + $0x60] sm:$0xff]  ;;  %v83_v11 = vld [vmem:[#allocation2 + $0x8] sm:$0xff]  ;;  %s659_s25 = scalar_lea.vmem %s407_s24, 384  ;;  %p664_p7 = scmp.lt.s32.totalorder %s407_s24, %s407_s24 }
  0x35   :  { %473 = vmatprep.subr.mxu0 %v693_v0  ;;  %490 = vmatprep.subr.mxu1 %v693_v0  ;;  %v199_v12 = vld [vmem:[#allocation7 + $0x50] sm:$0xff]  ;;  %v198_v13 = vld [vmem:[#allocation7 + $0x48] sm:$0xff]  ;;  %v84_v14 = vld [vmem:[#allocation2 + $0x10] sm:$0xf]  ;;  %p660_p6 = scmp.ne.s32.totalorder %s407_s24, %s659_s25  ;;  %p665_p8 = scmp.lt.s32.totalorder %s659_s25, %s659_s25 }
  0x36   :  { %474 = vmatpush3.msra.mxu0 %v87_v2  ;;  %491 = vmatpush3.msra.mxu1 %v203_v5  ;;  %v197_v15 = vld [vmem:[#allocation7 + $0x40] sm:$0xff]  ;;  %v196_v16 = vld [vmem:[#allocation7 + $0x38] sm:$0xff]  ;;  %v195_v17 = vld [vmem:[#allocation7 + $0x30] sm:$0xff] }
  0x37   :  { %475 = vmatprep.subr.mxu0 %v693_v0  ;;  %492 = vmatprep.subr.mxu1 %v693_v0  ;;  %v194_v18 = vld [vmem:[#allocation7 + $0x28] sm:$0xff]  ;;  %v193_v19 = vld [vmem:[#allocation7 + $0x20] sm:$0xff]  ;;  %v192_v20 = vld [vmem:[#allocation7 + $0x18] sm:$0xff]  ;;  %p666_p9 = por %p665_p8, %p664_p7 }
  0x38   :  { %476 = vmatpush3.msra.mxu0 %v86_v3  ;;  %493 = vmatpush3.msra.mxu1 %v202_v7  ;;  %v191_v21 = vld [vmem:[#allocation7 + $0x10] sm:$0xff]  ;;  %v190_v22 = vld [vmem:[#allocation7 + $0x8] sm:$0xff]  ;;  %v189_v23 = vld [vmem:[#allocation7] sm:$0xff] }
  0x39   :  { %477 = vmatprep.subr.mxu0 %v693_v0  ;;  %494 = vmatprep.subr.mxu1 %v693_v0  ;;  %v310_v24 = vld [vmem:[#allocation8 + $0x78] sm:$0xff]  ;;  %v309_v25 = vld [vmem:[#allocation8 + $0x70] sm:$0xff]  ;;  %v308_v26 = vld [vmem:[#allocation8 + $0x68] sm:$0xff]  ;;  %p667_p10 = pnand %p666_p9, %p660_p6 }
  0x3a   :  { %478 = vmatpush3.msra.mxu0 %v85_v6  ;;  %495 = vmatpush3.msra.mxu1 %v201_v9  ;;  %v307_v27 = vld [vmem:[#allocation8 + $0x60] sm:$0xff]  ;;  %v306_v28 = vld [vmem:[#allocation8 + $0x58] sm:$0xff]  ;;  %v305_v29 = vld [vmem:[#allocation8 + $0x50] sm:$0xff] }
  0x3b   :  { %480 = vmatmul.mubr.msk.f32.vlgmr.msra.gmra.mxu0 %vm96_vm1, %v82_v8  ;;  %496 = vmatprep.subr.mxu1 %v693_v0  ;;  %v304_v30 = vld [vmem:[#allocation8 + $0x48] sm:$0xff]  ;;  %v303_v31 = vld [vmem:[#allocation8 + $0x40] sm:$0xff]  ;;  %v302_v32 = vld [vmem:[#allocation8 + $0x38] sm:$0xff] }
  0x3c   :  { %482 = vmatprep.mubr.msk.f32.mxu0 %vm694_vm0, %v693_v0  ;;  %529 = vmatprep.subr.mxu0 %v693_v0  ;;  %v301_v33 = vld [vmem:[#allocation8 + $0x30] sm:$0xff]  ;;  %v300_v34 = vld [vmem:[#allocation8 + $0x28] sm:$0xff]  ;;  %v299_v35 = vld [vmem:[#allocation8 + $0x20] sm:$0xff] }
  0x3d   :  { %497 = vmatpush3.msra.mxu1 %v200_v10  ;;  %530 = vmatpush3.msra.mxu0 %v310_v24  ;;  %v298_v36 = vld [vmem:[#allocation8 + $0x18] sm:$0xff]  ;;  %v420_v37 = vld [vmem:[%s834_s2] ss:$0 sm:$0xff]  ;;  %v297_v50 = vld [vmem:[#allocation8 + $0x10] sm:$0xff] }
  0x3e   :  { %498 = vmatprep.subr.mxu1 %v693_v0  ;;  %531 = vmatprep.subr.mxu0 %v693_v0  ;;  %v296_v51 = vld [vmem:[#allocation8 + $0x8] sm:$0xff]  ;;  %v295_v52 = vld [vmem:[#allocation8] sm:$0xff] }
  0x3f   :  { %483 = vmatmul.mubr.msk.f32.gmra.mxu0 %vm96_vm1, %v83_v11  ;;  %499 = vmatpush3.msra.mxu1 %v199_v12  ;;  %v424_v53 = vld [vmem:[%s836_s4] ss:$0 sm:$0xff] }
  0x40   :  { %485 = vmatprep.mubr.msk.f32.mxu0 %vm694_vm0, %v693_v0  ;;  %500 = vmatprep.subr.mxu1 %v693_v0  ;;  %v425_v3 = vld [vmem:[%s838_s6] ss:$0 sm:$0xff] }
  0x41   :  { %501 = vmatpush3.msra.mxu1 %v198_v13  ;;  %532 = vmatpush3.msra.mxu0 %v309_v25 }
  0x42   :  { %502 = vmatprep.subr.mxu1 %v693_v0  ;;  %533 = vmatprep.subr.mxu0 %v693_v0 }
  0x43   :  { %486 = vmatmul.mubr.msk.f32.gmra.mxu0 %vm96_vm1, %v84_v14  ;;  %503 = vmatpush3.msra.mxu1 %v197_v15 }
  0x44   :  { %561 = vmatprep.mubr.msk.f32.mxu0 %vm694_vm0, %v693_v0  ;;  %504 = vmatprep.subr.mxu1 %v693_v0 }
  0x45   :  { %505 = vmatpush3.msra.mxu1 %v196_v16  ;;  %534 = vmatpush3.msra.mxu0 %v308_v26 }
  0x46   :  { %506 = vmatprep.subr.mxu1 %v693_v0  ;;  %535 = vmatprep.subr.mxu0 %v693_v0 }
  0x47   :  { %507 = vmatpush3.msra.mxu1 %v195_v17  ;;  %536 = vmatpush3.msra.mxu0 %v307_v27 }
  0x48   :  { %508 = vmatprep.subr.mxu1 %v693_v0  ;;  %537 = vmatprep.subr.mxu0 %v693_v0 }
  0x49   :  { %509 = vmatpush3.msra.mxu1 %v194_v18  ;;  %538 = vmatpush3.msra.mxu0 %v306_v28 }
  0x4a   :  { %510 = vmatprep.subr.mxu1 %v693_v0  ;;  %539 = vmatprep.subr.mxu0 %v693_v0 }
  0x4b   :  { %511 = vmatpush3.msra.mxu1 %v193_v19  ;;  %540 = vmatpush3.msra.mxu0 %v305_v29 }
  0x4c   :  { %512 = vmatprep.subr.mxu1 %v693_v0  ;;  %541 = vmatprep.subr.mxu0 %v693_v0 }
  0x4d   :  { %513 = vmatpush3.msra.mxu1 %v192_v20  ;;  %542 = vmatpush3.msra.mxu0 %v304_v30 }
  0x4e   :  { %514 = vmatprep.subr.mxu1 %v693_v0  ;;  %543 = vmatprep.subr.mxu0 %v693_v0 }
  0x4f   :  { %515 = vmatpush3.msra.mxu1 %v191_v21  ;;  %544 = vmatpush3.msra.mxu0 %v303_v31 }
  0x50   :  { %516 = vmatprep.subr.mxu1 %v693_v0  ;;  %545 = vmatprep.subr.mxu0 %v693_v0 }
  0x51   :  { %517 = vmatpush3.msra.mxu1 %v190_v22  ;;  %546 = vmatpush3.msra.mxu0 %v302_v32 }
  0x52   :  { %518 = vmatprep.subr.mxu1 %v693_v0  ;;  %547 = vmatprep.subr.mxu0 %v693_v0 }
  0x53   :  { %519 = vmatpush3.msra.mxu1 %v189_v23  ;;  %548 = vmatpush3.msra.mxu0 %v301_v33 }
  0x54   :  { %549 = vmatprep.subr.mxu0 %v693_v0 }
  0x55   :  { %550 = vmatpush3.msra.mxu0 %v300_v34 }
  0x56   :  { %551 = vmatprep.subr.mxu0 %v693_v0 }
  0x57   :  { %552 = vmatpush3.msra.mxu0 %v299_v35 }
  0x58   :  { %553 = vmatprep.subr.mxu0 %v693_v0 }
  0x59   :  { %554 = vmatpush3.msra.mxu0 %v298_v36 }
  0x5a   :  { %555 = vmatprep.subr.mxu0 %v693_v0 }
  0x5b   :  { %556 = vmatpush3.msra.mxu0 %v297_v50 }
  0x5c   :  { %557 = vmatprep.subr.mxu0 %v693_v0 }
  0x5d   :  { %558 = vmatpush3.msra.mxu0 %v296_v51 }
  0x5e   :  { %559 = vmatprep.subr.mxu0 %v693_v0 }
  0x5f   :  { %560 = vmatpush3.msra.mxu0 %v295_v52 }
  0xfb   :  { %v172_v38 = vpop.f32.mrf.mxu0 }
  0xfc   :  { %v173_v39 = vadd.f32 %v420_v37, %v172_v38 }
  0xfd   :  { %v481_v40 = vpop.f32.mrf.mxu0 }
  0xfe   :  { %v186_v41 = vmax.f32 %v173_v39, 0.0 }
  0xff   :  { %v177_v42 = vpop.f32.mrf.mxu0 }
 0x100   :  { %v178_v43 = vadd.f32 %v420_v37, %v177_v42  ;;  %521 = vmatmul.mubr.f32.vlgmr.msra.gmra.mxu1 %v186_v41 }
 0x101   :  { %v484_v44 = vpop.f32.mrf.mxu0  ;;  %523 = vmatprep.mubr.msk.f32.mxu1 %vm694_vm0, %v693_v0 }
 0x102   :  { %v187_v45 = vmax.f32 %v178_v43, 0.0 }
 0x103   :  { %v182_v46 = vpop.f32.mrf.mxu0 }
 0x104   :  { %v183_v47 = vadd.f32 %v420_v37, %v182_v46  ;;  %524 = vmatmul.mubr.f32.gmra.mxu1 %v187_v45 }
 0x105   :  { %v487_v48 = vpop.f32.mrf.mxu0  ;;  %526 = vmatprep.mubr.msk.f32.mxu1 %vm694_vm0, %v693_v0 }
 0x106   :  { %v188_v49 = vmax.f32 %v183_v47, 0.0 }
 0x108   :  { %527 = vmatmul.mubr.f32.gmra.mxu1 %v188_v49 }
 0x1c0   :  { %v278_v54 = vpop.f32.mrf.mxu1 }
 0x1c1   :  { %v279_v55 = vadd.f32 %v424_v53, %v278_v54 }
 0x1c2   :  { %v522_v56 = vpop.f32.mrf.mxu1 }
 0x1c3   :  { %v292_v57 = vmax.f32 %v279_v55, 0.0 }
 0x1c4   :  { %v283_v58 = vpop.f32.mrf.mxu1 }
 0x1c5   :  { %v284_v59 = vadd.f32 %v424_v53, %v283_v58  ;;  %562 = vmatmul.mubr.f32.vlgmr.msra.gmra.mxu0 %v292_v57 }
 0x1c6   :  { %v525_v60 = vpop.f32.mrf.mxu1  ;;  %564 = vmatprep.mubr.msk.f32.mxu0 %vm694_vm0, %v693_v0 }
 0x1c7   :  { %v293_v61 = vmax.f32 %v284_v59, 0.0 }
 0x1c8   :  { %v288_v62 = vpop.f32.mrf.mxu1 }
 0x1c9   :  { %v289_v63 = vadd.f32 %v424_v53, %v288_v62  ;;  %565 = vmatmul.mubr.f32.gmra.mxu0 %v293_v61 }
 0x1ca   :  { %v528_v1 = vpop.f32.mrf.mxu1  ;;  %567 = vmatprep.mubr.msk.f32.mxu0 %vm694_vm0, %v693_v0 }
 0x1cb   :  { %v294_v2 = vmax.f32 %v289_v63, 0.0 }
 0x1cd   :  { %568 = vmatmul.mubr.f32.gmra.mxu0 %v294_v2 }
 0x285   :  { %v384_v4 = vpop.f32.mrf.mxu0 }
 0x286   :  { %v385_v5 = vadd.f32 %v425_v3, %v384_v4 }
 0x287   :  { %v563_v6 = vpop.f32.mrf.mxu0 }
 0x288   :  { %398 = vst [vmem:[#allocation10] sm:$0xff] %v385_v5 }
 0x289   :  { %v389_v7 = vpop.f32.mrf.mxu0 }
 0x28a   :  { %v390_v8 = vadd.f32 %v425_v3, %v389_v7 }
 0x28b   :  { %v566_v9 = vpop.f32.mrf.mxu0 }
 0x28c   :  { %399 = vst [vmem:[#allocation10 + $0x8] sm:$0xff] %v390_v8 }
 0x28d   :  { %v394_v10 = vpop.f32.mrf.mxu0 }
 0x28e   :  { %v395_v11 = vadd.f32 %v425_v3, %v394_v10 }
 0x28f   :  { %v569_v0 = vpop.f32.mrf.mxu0 }
 0x290   :  { %400 = vst [vmem:[#allocation10 + $0x10] sm:$0xf] %v395_v11 }
 0x291   :  { %670 = shalt.err (!%p667_p10)
}
 0x292   :  { %412 = dma.vmem_to_hbm [thread:$0]  %s407_s24, 384, %s839_s7, [#allocation4], %s689_s29, %s689_s29, %s690_s30  }
 0x293   :  { %685 = dma.done.wait [#allocation4], 384  }
 0x294   :  { %686 = vsyncadd [#allocation4], 4294966912 }
 0x295   :  { %416 = vsyncpa [#allocation3], 1 }
 0x296   :  { %417 = vsyncpa [#allocation6], 1 }
 0x297   :  { %418 = vsyncpa [#allocation9], 1 }
 0x298   :  { %419 = vsyncpa [#allocation4], 1 }

</bundles_post_ra>
